<compile_context>
chip_gen: v7x
topology: tpu7x:2x2x1
jax: 0.10.0
libtpu: 0.0.40
codegen_flags: <defaults>
</compile_context>

<pallas_src>
import jax
import jax.numpy as jnp
from jax.experimental import pallas as pl
from jax.experimental.pallas import tpu as pltpu


def _netsam_kernel(x_ref, w1_ref, b1_ref, w2_ref, b2_ref, w3_ref, b3_ref, o_ref):
    # x arrives in f32; cast to bf16 here (VPU work, hidden under the x DMA).
    x = x_ref[...].astype(jnp.bfloat16)                       # (TB, 784)

    # l1 + ReLU  (bf16 MXU matmul, f32 accumulation)
    h1 = jnp.dot(x, w1_ref[...], preferred_element_type=jnp.float32)
    h1 = jnp.maximum(h1 + b1_ref[...], 0.0)

    # l2 + ReLU
    h2 = jnp.dot(h1.astype(jnp.bfloat16), w2_ref[...],
                 preferred_element_type=jnp.float32)
    h2 = jnp.maximum(h2 + b2_ref[...], 0.0)

    # l3 + sigmoid (exact; EUP exp + VALU divide are far off the critical path)
    z = jnp.dot(h2.astype(jnp.bfloat16), w3_ref[...],
                preferred_element_type=jnp.float32) + b3_ref[...]
    s = 1.0 / (1.0 + jnp.exp(-z))

    # log_softmax over the class dim (dim=1)
    m = jnp.max(s, axis=-1, keepdims=True)
    e = jnp.exp(s - m)
    lse = jnp.log(jnp.sum(e, axis=-1, keepdims=True)) + m
    o_ref[...] = (s - lse).astype(o_ref.dtype)


def _round_up(x, m):
    return ((x + m - 1) // m) * m


def _tensorcores_per_chip():
    """v7x packs 2 TensorCores per chip; v5e/v6e have 1."""
    try:
        kind = jax.devices()[0].device_kind.lower()
    except Exception:  # no device visible at trace time -> assume single-TC
        return 1
    return 2 if ("v7" in kind or "7x" in kind) else 1


def _pick_tile(b, tile_b, num_tc):
    """Choose the batch-tile size.

    HBM-bound on x, so bigger tiles (fewer grid steps) win.  Cap: 2048 rows
    (f32 x double-buffered ~= 12.8 MB) on single-TC chips, 4096 on v7x
    (~25.7 MB, comfortably inside its VMEM once vmem_limit_bytes is raised).
    Only on 2-TC chips do we split a one-tile batch in two so the "parallel"
    grid axis feeds both TensorCores.
    """
    cap = 4096 if num_tc >= 2 else 2048
    if tile_b is not None:
        cap = max(8, min(int(tile_b), 8192))
    b8 = _round_up(max(b, 1), 8)
    tb = min(cap, b8)
    if num_tc >= 2 and b8 >= 512 and tb == b8:
        tb = _round_up((b8 + 1) // 2, 8)   # give each TensorCore one tile
    return tb


def netsam_forward(x, params, *, tile_b=None):
    """x: (B, ...) image batch (e.g. (B,1,28,28)) or (B, 784) already flat.
    Returns (B, output_size) log-probabilities in f32.

    Note: matmul operands (x, weights) run in bf16 with f32 accumulation, so
    results differ from a pure-f32 PyTorch forward at roughly the 1e-2 level.
    """
    w1, b1, w2, b2, w3, b3 = params
    b = x.shape[0]
    d_in = w1.shape[0]
    h1, h2, d_out = w1.shape[1], w2.shape[1], w3.shape[1]

    x2d = x.reshape(b, -1)                       # x.view(x.size(0), -1)
    assert x2d.shape[1] == d_in
    x2d = x2d.astype(jnp.float32)                # no-op for f32 inputs

    tb = _pick_tile(b, tile_b, _tensorcores_per_chip())
    grid = (pl.cdiv(b, tb),)                     # last block padded by Pallas

    # One-time tiny casts for the resident operands (~0.2 MB total).
    w1b, w2b, w3b = (w.astype(jnp.bfloat16) for w in (w1, w2, w3))
    b1f, b2f, b3f = (bb.astype(jnp.float32).reshape(1, -1) for bb in (b1, b2, b3))

    # Double-buffered f32 x tile + f32 out tile + resident weights, with headroom.
    vmem_limit = (40 if tb > 2048 else 32) * 1024 * 1024

    cost = pl.CostEstimate(
        flops=2 * b * (d_in * h1 + h1 * h2 + h2 * d_out),
        transcendentals=3 * b * d_out,                              # exp(-z), exp(s-m), log
        bytes_accessed=(b * d_in * 4                                # x (f32)
                        + (d_in * h1 + h1 * h2 + h2 * d_out) * 2    # weights (bf16)
                        + (h1 + h2 + d_out) * 4                     # biases (f32)
                        + b * d_out * 4),                           # output (f32)
    )

    def _resident(shape):
        # Constant index map -> fetched once, kept VMEM-resident across steps.
        return pl.BlockSpec(shape, lambda i: (0, 0))

    call = pl.pallas_call(
        _netsam_kernel,
        out_shape=jax.ShapeDtypeStruct((b, d_out), jnp.float32),
        grid_spec=pltpu.PrefetchScalarGridSpec(
            num_scalar_prefetch=0,
            grid=grid,
            in_specs=[
                pl.BlockSpec((tb, d_in), lambda i: (i, 0)),       # x tile (pipelined)
                _resident((d_in, h1)),   _resident((1, h1)),      # W1, b1
                _resident((h1, h2)),     _resident((1, h2)),      # W2, b2
                _resident((h2, d_out)),  _resident((1, d_out)),   # W3, b3
            ],
            out_specs=pl.BlockSpec((tb, d_out), lambda i: (i, 0)),
        ),
        compiler_params=pltpu.CompilerParams(
            dimension_semantics=("parallel",),     # batch tiles are independent
            vmem_limit_bytes=vmem_limit,
        ),
        cost_estimate=cost,
    )
    return call(x2d, w1b, b1f, w2b, b2f, w3b, b3f)


def init_params(key, input_size=784, hidden_sizes=(128, 64), output_size=10):
    """nn.Linear-style init: U(-1/sqrt(fan_in), 1/sqrt(fan_in)) for W and b.
    Weights stored as (in, out) so the kernel computes x @ W + b."""
    dims = [input_size, hidden_sizes[0], hidden_sizes[1], output_size]
    params = []
    keys = jax.random.split(key, 2 * (len(dims) - 1))
    for li in range(len(dims) - 1):
        fan_in, fan_out = dims[li], dims[li + 1]
        bound = 1.0 / (fan_in ** 0.5)
        w = jax.random.uniform(keys[2 * li], (fan_in, fan_out),
                               minval=-bound, maxval=bound, dtype=jnp.float32)
        bvec = jax.random.uniform(keys[2 * li + 1], (1, fan_out),
                                  minval=-bound, maxval=bound, dtype=jnp.float32)
        params.extend([w, bvec])
    return tuple(params)


def netsam_reference(x, params):
    """Pure-JAX f32 reference mirroring the PyTorch forward."""
    w1, b1, w2, b2, w3, b3 = params
    x2d = x.reshape(x.shape[0], -1).astype(jnp.float32)
    h1 = jnp.maximum(x2d @ w1 + b1, 0.0)
    h2 = jnp.maximum(h1 @ w2 + b2, 0.0)
    s = jax.nn.sigmoid(h2 @ w3 + b3)
    return jax.nn.log_softmax(s, axis=-1)


if __name__ == "__main__":
    key = jax.random.PRNGKey(0)
    k_x, k_p = jax.random.split(key)

    # Small deterministic input: batch=13 MNIST-shaped images (exercises the
    # padded-last-block path, since 13 is not a multiple of the 8-row sublane).
    x = jax.random.normal(k_x, (13, 1, 28, 28), dtype=jnp.float32)
    params = init_params(k_p)

    out = netsam_forward(x, params)
    jax.block_until_ready(out)

    assert out.shape == (13, 10)
    # log_softmax rows must exponentiate-sum to 1.
    row_sums = jnp.sum(jnp.exp(out), axis=-1)
    assert bool(jnp.all(jnp.abs(row_sums - 1.0) < 1e-4))
    # Match the pure f32 reference to within bf16-matmul tolerance.
    ref = netsam_reference(x, params)
    assert bool(jnp.max(jnp.abs(out - ref)) < 5e-2)

    print("KERNEL_OK")
</pallas_src>

<mosaic_0001>
module attributes {stable_mosaic.version = 11 : i64} {
  func.func @_netsam_kernel(%arg0: i32, %arg1: memref<16x784xf32, #tpu.memory_space<vmem>>, %arg2: memref<784x128xbf16, #tpu.memory_space<vmem>>, %arg3: memref<1x128xf32, #tpu.memory_space<vmem>>, %arg4: memref<128x64xbf16, #tpu.memory_space<vmem>>, %arg5: memref<1x64xf32, #tpu.memory_space<vmem>>, %arg6: memref<64x10xbf16, #tpu.memory_space<vmem>>, %arg7: memref<1x10xf32, #tpu.memory_space<vmem>>, %arg8: memref<16x10xf32, #tpu.memory_space<vmem>>) attributes {dimension_semantics = [#tpu.dimension_semantics<parallel>], iteration_bounds = array<i64: 1>, scalar_prefetch = 0 : i64, scratch_operands = 0 : i64, tpu.core_type = #tpu.core_type<tc>, window_params = [{transform_indices = @transform_0, window_bounds = array<i64: 16, 784>}, {pipeline_mode = #tpu.pipeline_mode<synchronous>, transform_indices = @transform_1, window_bounds = array<i64: 784, 128>}, {pipeline_mode = #tpu.pipeline_mode<synchronous>, transform_indices = @transform_2, window_bounds = array<i64: 1, 128>}, {pipeline_mode = #tpu.pipeline_mode<synchronous>, transform_indices = @transform_3, window_bounds = array<i64: 128, 64>}, {pipeline_mode = #tpu.pipeline_mode<synchronous>, transform_indices = @transform_4, window_bounds = array<i64: 1, 64>}, {pipeline_mode = #tpu.pipeline_mode<synchronous>, transform_indices = @transform_5, window_bounds = array<i64: 64, 10>}, {pipeline_mode = #tpu.pipeline_mode<synchronous>, transform_indices = @transform_6, window_bounds = array<i64: 1, 10>}, {transform_indices = @transform_7, window_bounds = array<i64: 16, 10>}]} {
    %c0 = arith.constant 0 : index
    %c0_0 = arith.constant 0 : index
    %0 = vector.load %arg1[%c0, %c0_0] : memref<16x784xf32, #tpu.memory_space<vmem>>, vector<16x784xf32>
    %1 = arith.truncf %0 : vector<16x784xf32> to vector<16x784xbf16>
    %c0_1 = arith.constant 0 : index
    %c0_2 = arith.constant 0 : index
    %2 = vector.load %arg2[%c0_1, %c0_2] : memref<784x128xbf16, #tpu.memory_space<vmem>>, vector<784x128xbf16>
    %cst = arith.constant dense<0.000000e+00> : vector<16x128xf32>
    %3 = tpu.matmul %1, %2, %cst {dimension_numbers = #tpu.dot_dimension_numbers<[1], [0], [0], [1], [0, 0, 1, 1], [], []>} : vector<16x784xbf16>, vector<784x128xbf16>, vector<16x128xf32> -> vector<16x128xf32>
    %c0_3 = arith.constant 0 : index
    %c0_4 = arith.constant 0 : index
    %4 = vector.load %arg3[%c0_3, %c0_4] : memref<1x128xf32, #tpu.memory_space<vmem>>, vector<1x128xf32>
    %5 = vector.broadcast %4 : vector<1x128xf32> to vector<16x128xf32>
    %6 = arith.addf %3, %5 : vector<16x128xf32>
    %cst_5 = arith.constant 0.000000e+00 : f32
    %7 = vector.broadcast %cst_5 : f32 to vector<16x128xf32>
    %8 = arith.maximumf %6, %7 : vector<16x128xf32>
    %9 = arith.truncf %8 : vector<16x128xf32> to vector<16x128xbf16>
    %c0_6 = arith.constant 0 : index
    %c0_7 = arith.constant 0 : index
    %10 = vector.load %arg4[%c0_6, %c0_7] : memref<128x64xbf16, #tpu.memory_space<vmem>>, vector<128x64xbf16>
    %cst_8 = arith.constant dense<0.000000e+00> : vector<16x64xf32>
    %11 = tpu.matmul %9, %10, %cst_8 {dimension_numbers = #tpu.dot_dimension_numbers<[1], [0], [0], [1], [0, 0, 1, 1], [], []>} : vector<16x128xbf16>, vector<128x64xbf16>, vector<16x64xf32> -> vector<16x64xf32>
    %c0_9 = arith.constant 0 : index
    %c0_10 = arith.constant 0 : index
    %12 = vector.load %arg5[%c0_9, %c0_10] : memref<1x64xf32, #tpu.memory_space<vmem>>, vector<1x64xf32>
    %13 = vector.broadcast %12 : vector<1x64xf32> to vector<16x64xf32>
    %14 = arith.addf %11, %13 : vector<16x64xf32>
    %cst_11 = arith.constant 0.000000e+00 : f32
    %15 = vector.broadcast %cst_11 : f32 to vector<16x64xf32>
    %16 = arith.maximumf %14, %15 : vector<16x64xf32>
    %17 = arith.truncf %16 : vector<16x64xf32> to vector<16x64xbf16>
    %c0_12 = arith.constant 0 : index
    %c0_13 = arith.constant 0 : index
    %18 = vector.load %arg6[%c0_12, %c0_13] : memref<64x10xbf16, #tpu.memory_space<vmem>>, vector<64x10xbf16>
    %cst_14 = arith.constant dense<0.000000e+00> : vector<16x10xf32>
    %19 = tpu.matmul %17, %18, %cst_14 {dimension_numbers = #tpu.dot_dimension_numbers<[1], [0], [0], [1], [0, 0, 1, 1], [], []>} : vector<16x64xbf16>, vector<64x10xbf16>, vector<16x10xf32> -> vector<16x10xf32>
    %c0_15 = arith.constant 0 : index
    %c0_16 = arith.constant 0 : index
    %20 = vector.load %arg7[%c0_15, %c0_16] : memref<1x10xf32, #tpu.memory_space<vmem>>, vector<1x10xf32>
    %21 = vector.broadcast %20 : vector<1x10xf32> to vector<16x10xf32>
    %22 = arith.addf %19, %21 : vector<16x10xf32>
    %cst_17 = arith.constant 0.000000e+00 : f32
    %23 = vector.broadcast %cst_17 : f32 to vector<16x10xf32>
    %24 = arith.subf %23, %22 : vector<16x10xf32>
    %25 = math.exp %24 : vector<16x10xf32>
    %cst_18 = arith.constant 1.000000e+00 : f32
    %26 = vector.broadcast %cst_18 : f32 to vector<16x10xf32>
    %27 = arith.addf %26, %25 : vector<16x10xf32>
    %cst_19 = arith.constant 1.000000e+00 : f32
    %28 = vector.broadcast %cst_19 : f32 to vector<16x10xf32>
    %29 = arith.divf %28, %27 : vector<16x10xf32>
    %cst_20 = arith.constant dense<0xFF800000> : vector<16xf32>
    %30 = vector.multi_reduction <maximumf>, %29, %cst_20 [1] : vector<16x10xf32> to vector<16xf32>
    %31 = vector.shape_cast %30 : vector<16xf32> to vector<16x1xf32>
    %32 = vector.broadcast %31 : vector<16x1xf32> to vector<16x10xf32>
    %33 = arith.subf %29, %32 : vector<16x10xf32>
    %34 = math.exp %33 : vector<16x10xf32>
    %cst_21 = arith.constant dense<0.000000e+00> : vector<16xf32>
    %35 = vector.multi_reduction <add>, %34, %cst_21 [1] : vector<16x10xf32> to vector<16xf32>
    %36 = vector.shape_cast %35 : vector<16xf32> to vector<16x1xf32>
    %37 = math.log %36 : vector<16x1xf32>
    %38 = arith.addf %37, %31 : vector<16x1xf32>
    %39 = vector.broadcast %38 : vector<16x1xf32> to vector<16x10xf32>
    %40 = arith.subf %29, %39 : vector<16x10xf32>
    %c0_22 = arith.constant 0 : index
    %c0_23 = arith.constant 0 : index
    %41 = vector.load %arg8[%c0_22, %c0_23] : memref<16x10xf32, #tpu.memory_space<vmem>>, vector<16x10xf32>
    tpu.vector_store %arg8[%c0_22, %c0_23], %40 {strides = array<i32>} : memref<16x10xf32, #tpu.memory_space<vmem>>, vector<16x10xf32>,
    return
  }
  func.func @transform_0(%arg0: i32) -> (i32, i32) {
    %c0_i32 = arith.constant 0 : i32
    %c0_i32_0 = arith.constant 0 : i32
    return %arg0, %c0_i32 : i32, i32
  }
  func.func @transform_1(%arg0: i32) -> (i32, i32) {
    %c0_i32 = arith.constant 0 : i32
    %c0_i32_0 = arith.constant 0 : i32
    %c0_i32_1 = arith.constant 0 : i32
    return %c0_i32, %c0_i32_0 : i32, i32
  }
  func.func @transform_2(%arg0: i32) -> (i32, i32) {
    %c0_i32 = arith.constant 0 : i32
    %c0_i32_0 = arith.constant 0 : i32
    %c0_i32_1 = arith.constant 0 : i32
    return %c0_i32, %c0_i32_0 : i32, i32
  }
  func.func @transform_3(%arg0: i32) -> (i32, i32) {
    %c0_i32 = arith.constant 0 : i32
    %c0_i32_0 = arith.constant 0 : i32
    %c0_i32_1 = arith.constant 0 : i32
    return %c0_i32, %c0_i32_0 : i32, i32
  }
  func.func @transform_4(%arg0: i32) -> (i32, i32) {
    %c0_i32 = arith.constant 0 : i32
    %c0_i32_0 = arith.constant 0 : i32
    %c0_i32_1 = arith.constant 0 : i32
    return %c0_i32, %c0_i32_0 : i32, i32
  }
  func.func @transform_5(%arg0: i32) -> (i32, i32) {
    %c0_i32 = arith.constant 0 : i32
    %c0_i32_0 = arith.constant 0 : i32
    %c0_i32_1 = arith.constant 0 : i32
    return %c0_i32, %c0_i32_0 : i32, i32
  }
  func.func @transform_6(%arg0: i32) -> (i32, i32) {
    %c0_i32 = arith.constant 0 : i32
    %c0_i32_0 = arith.constant 0 : i32
    %c0_i32_1 = arith.constant 0 : i32
    return %c0_i32, %c0_i32_0 : i32, i32
  }
  func.func @transform_7(%arg0: i32) -> (i32, i32) {
    %c0_i32 = arith.constant 0 : i32
    %c0_i32_0 = arith.constant 0 : i32
    return %arg0, %c0_i32 : i32, i32
  }
}

</mosaic_0001>

<bundles_post_ra>
// kernel: tpu_custom_call.1
= control target key start
LH: loop header
LB: loop body
LE: loop exit
PB: predicated region body
PF: predicated region fallthrough
CT: control target
= control target key end

     0   :  { %12 = vsyncpa [#allocation3], 0  ;;  %s1393_s0 = inlined_call_operand.vmem [shape: f32[13,784], index: 0, kind: input, shape index: {}]   ;;  %s1394_s1 = inlined_call_operand.hbm [shape: bf16[784,128], index: 1, kind: input, shape index: {}]   ;;  %s1395_s2 = inlined_call_operand.vmem [shape: f32[1,128], index: 2, kind: input, shape index: {}]   ;;  %s1396_s3 = inlined_call_operand.vmem [shape: bf16[128,64], index: 3, kind: input, shape index: {}]   ;;  %s1397_s4 = inlined_call_operand.vmem [shape: f32[1,64], index: 4, kind: input, shape index: {}]   ;;  %s1398_s5 = inlined_call_operand.vmem [shape: bf16[64,10], index: 5, kind: input, shape index: {}]   ;;  %s1399_s6 = inlined_call_operand.vmem [shape: f32[1,10], index: 6, kind: input, shape index: {}]   ;;  %s1400_s7 = inlined_call_operand.hbm [shape: f32[13,10], index: 7, kind: output, shape index: {}]  }
   0x1   :  { %13 = vsyncpa [#allocation4], 0  ;;  %s1209_s24 = smov [#allocation2]   ;;  %s1161_s28 = scalar_lea.hbm %s1394_s1, 6272 }
   0x2   :  { %s21_s25 = sshll.u32 %s1209_s24, 4  ;;  %p1162_p0 = scmp.ne.s32.totalorder %s1394_s1, %s1161_s28  ;;  %s22_s25 = int_to_ptr.vmem [resolvable:$true] %s21_s25 }
   0x3   :  { %p1165_p1 = scmp.lt.u32.totalorder %s1161_s28, %s1394_s1 }
   0x5   :  { %p1167_p2 = pnand %p1165_p1, %p1162_p0 }
   0x7   :  { %1170 = shalt.err (!%p1167_p2)
}
   0x8   :  { %s1171_s10 = scalar_lea.vmem %s22_s25, 6272  ;;  %p1176_p4 = scmp.lt.s32.totalorder %s22_s25, %s22_s25 }
   0x9   :  { %p1172_p3 = scmp.ne.s32.totalorder %s22_s25, %s1171_s10  ;;  %p1177_p5 = scmp.lt.s32.totalorder %s1171_s10, %s1171_s10 }
   0xb   :  { %p1178_p6 = por %p1177_p5, %p1176_p4 }
   0xd   :  { %p1179_p7 = pnand %p1178_p6, %p1172_p3 }
   0xf   :  { %1182 = shalt.err (!%p1179_p7)
}
  0x10   :  { %s1210_s11 = smov 64   ;;  %s1211_s12 = smov 4  }
  0x11   :  { %27 = dma.hbm_to_vmem [thread:$0]  %s1394_s1, 6272, %s22_s25, [#allocation3], %s1210_s11, %s1210_s11, %s1211_s12  }
  0x12   :  { %1205 = dma.done.wait [#allocation3], 6272  }
  0x13   :  { %1206 = vsyncadd [#allocation3], 4294961024  ;;  %v1084_v0 = vld [vmem:[#allocation2 + $0x40] sm:$0xff]   ;;  %v1088_v4 = vld [vmem:[#allocation2 + $0x48] sm:$0xff]   ;;  %v1212_v43 = vmov 0.0   ;;  %vm1213_vm0 = vmmov 0  }
  0x14   :  { %v1085_v1 = vld [vmem:[#allocation2] sm:$0xff]   ;;  %956 = vmatprep.subr.bf16.mxu0 %v1084_v0  ;;  %v1089_v5 = vld [vmem:[#allocation2 + $0x8] sm:$0xff]   ;;  %v1092_v8 = vld [vmem:[#allocation2 + $0x50] sm:$0xff]   ;;  %vm462_vm1 = vcmask 130048   ;;  %vm787_vm2 = vcmask 523264   ;;  %vm844_vm3 = vcmask 80896  }
  0x15   :  { %v1086_v2 = vld [vmem:[#allocation2 + $0xc0] sm:$0xff]   ;;  %957 = vmatpush3.bf16.msra.mxu0 %v1085_v1  ;;  %v1090_v6 = vld [vmem:[#allocation2 + $0xc8] sm:$0xff]   ;;  %v1093_v9 = vld [vmem:[#allocation2 + $0x10] sm:$0xff]  }
  0x16   :  { %v1087_v3 = vld [vmem:[#allocation2 + $0x80] sm:$0xff]   ;;  %978 = vmatprep.subr.bf16.mxu1 %v1086_v2  ;;  %958 = vmatprep.subr.bf16.mxu0 %v1088_v4  ;;  %v1091_v7 = vld [vmem:[#allocation2 + $0x88] sm:$0xff]   ;;  %v1094_v10 = vld [vmem:[#allocation2 + $0xd0] sm:$0xff]  }
  0x17   :  { %979 = vmatpush3.bf16.msra.mxu1 %v1087_v3  ;;  %v1095_v11 = vld [vmem:[#allocation2 + $0x90] sm:$0xff]   ;;  %v1096_v12 = vld [vmem:[#allocation2 + $0x58] sm:$0xff]   ;;  %v1100_v16 = vld [vmem:[#allocation2 + $0x60] sm:$0xff]  }
  0x18   :  { %980 = vmatprep.subr.bf16.mxu1 %v1090_v6  ;;  %v1097_v13 = vld [vmem:[#allocation2 + $0x18] sm:$0xff]   ;;  %v1101_v17 = vld [vmem:[#allocation2 + $0x20] sm:$0xff]   ;;  %v1104_v20 = vld [vmem:[#allocation2 + $0x68] sm:$0xff]  }
  0x19   :  { %959 = vmatpush3.bf16.msra.mxu0 %v1089_v5  ;;  %v1098_v14 = vld [vmem:[#allocation2 + $0xd8] sm:$0xff]   ;;  %v1102_v18 = vld [vmem:[#allocation2 + $0xe0] sm:$0xff]   ;;  %v1105_v21 = vld [vmem:[#allocation2 + $0x28] sm:$0xff]  }
  0x1a   :  { %960 = vmatprep.subr.bf16.mxu0 %v1092_v8  ;;  %v1099_v15 = vld [vmem:[#allocation2 + $0x98] sm:$0xff]   ;;  %v1103_v19 = vld [vmem:[#allocation2 + $0xa0] sm:$0xff]   ;;  %v1106_v22 = vld [vmem:[#allocation2 + $0xe8] sm:$0xff]  }
  0x1b   :  { %981 = vmatpush3.bf16.msra.mxu1 %v1091_v7  ;;  %v1107_v23 = vld [vmem:[#allocation2 + $0xa8] sm:$0xff]   ;;  %v1108_v24 = vld [vmem:[#allocation2 + $0x70] sm:$0xff]   ;;  %v1112_v28 = vld [vmem:[#allocation2 + $0x78] sm:$0xff]  }
  0x1c   :  { %982 = vmatprep.subr.bf16.mxu1 %v1094_v10  ;;  %v1109_v25 = vld [vmem:[#allocation2 + $0x30] sm:$0xff]   ;;  %v1113_v29 = vld [vmem:[#allocation2 + $0x38] sm:$0xff]   ;;  %v43_v31 = vld [vmem:[%s1393_s0 + $0x8] sm:$0xff] }
  0x1d   :  { %961 = vmatpush3.bf16.msra.mxu0 %v1093_v9  ;;  %v1110_v26 = vld [vmem:[#allocation2 + $0xf0] sm:$0xff]   ;;  %v1114_v30 = vld [vmem:[#allocation2 + $0xf8] sm:$0xff]   ;;  %v50_v32 = vld [vmem:[%s1393_s0 + $0x40] sm:$0xff] }
  0x1e   :  { %962 = vmatprep.subr.bf16.mxu0 %v1096_v12  ;;  %v1111_v27 = vld [vmem:[#allocation2 + $0xb0] sm:$0xff]   ;;  %v57_v33 = vpack.c.bf16 %v50_v32, %v43_v31  ;;  %v1115_v34 = vld [vmem:[#allocation2 + $0xb8] sm:$0xff]   ;;  %v42_v35 = vld [vmem:[%s1393_s0] sm:$0xff] }
  0x1f   :  { %983 = vmatpush3.bf16.msra.mxu1 %v1095_v11  ;;  %v49_v36 = vld [vmem:[%s1393_s0 + $0x38] sm:$0xff]  ;;  %v1116_v38 = vld [vmem:[#allocation2 + $0x140] sm:$0xff]   ;;  %v52_v40 = vld [vmem:[%s1393_s0 + $0x50] sm:$0xff] }
  0x20   :  { %984 = vmatprep.subr.bf16.mxu1 %v1098_v14  ;;  %498 = vmatprep.mubr.bf16.mxu0 %v57_v33  ;;  %v56_v37 = vpack.c.bf16 %v49_v36, %v42_v35  ;;  %v45_v39 = vld [vmem:[%s1393_s0 + $0x18] sm:$0xff]  ;;  %v1117_v42 = vld [vmem:[#allocation2 + $0x100] sm:$0xff]   ;;  %v44_v44 = vld [vmem:[%s1393_s0 + $0x10] sm:$0xff] }
  0x21   :  { %963 = vmatpush3.bf16.msra.mxu0 %v1097_v13  ;;  %v59_v41 = vpack.c.bf16 %v52_v40, %v45_v39  ;;  %v51_v45 = vld [vmem:[%s1393_s0 + $0x48] sm:$0xff]  ;;  %v1120_v49 = vld [vmem:[#allocation2 + $0x150] sm:$0xff]   ;;  %v1122_v51 = vld [vmem:[#allocation2 + $0x158] sm:$0xff]  }
  0x22   :  { %964 = vmatprep.subr.bf16.mxu0 %v1100_v16  ;;  %v58_v46 = vpack.c.bf16 %v51_v45, %v44_v44  ;;  %v1118_v47 = vld [vmem:[#allocation2 + $0x148] sm:$0xff]   ;;  %v1121_v50 = vld [vmem:[#allocation2 + $0x110] sm:$0xff]   ;;  %v1123_v52 = vld [vmem:[#allocation2 + $0x118] sm:$0xff]  }
  0x23   :  { %985 = vmatpush3.bf16.msra.mxu1 %v1099_v15  ;;  %539 = vmatprep.mubr.bf16.mxu1 %v59_v41  ;;  %v1119_v48 = vld [vmem:[#allocation2 + $0x108] sm:$0xff]   ;;  %v1124_v53 = vld [vmem:[#allocation2 + $0x160] sm:$0xff]   ;;  %v1128_v59 = vld [vmem:[#allocation2 + $0x170] sm:$0xff]  }
  0x24   :  { %986 = vmatprep.subr.bf16.mxu1 %v1102_v18  ;;  %v1125_v54 = vld [vmem:[#allocation2 + $0x120] sm:$0xff]   ;;  %v1126_v55 = vld [vmem:[#allocation2 + $0x168] sm:$0xff]   ;;  %v48_v62 = vld [vmem:[%s1393_s0 + $0x30] sm:$0xff] }
  0x25   :  { %965 = vmatpush3.bf16.msra.mxu0 %v1101_v17  ;;  %v1132_v56 = vld [vmem:[#allocation2 + $0x180] sm:$0xff]   ;;  %v47_v57 = vld [vmem:[%s1393_s0 + $0x28] sm:$0xff]  ;;  %v1129_v1 = vld [vmem:[#allocation2 + $0x130] sm:$0xff]  }
  0x26   :  { %966 = vmatprep.subr.bf16.mxu0 %v1104_v20  ;;  %v1127_v58 = vld [vmem:[#allocation2 + $0x128] sm:$0xff]   ;;  %v54_v60 = vld [vmem:[%s1393_s0 + $0x60] sm:$0xff]  ;;  %v1130_v2 = vld [vmem:[#allocation2 + $0x178] sm:$0xff]  }
  0x27   :  { %987 = vmatpush3.bf16.msra.mxu1 %v1103_v19  ;;  %v61_v61 = vpack.c.bf16 %v54_v60, %v47_v57  ;;  %v55_v63 = vld [vmem:[%s1393_s0 + $0x68] sm:$0xff]  ;;  %v1131_v3 = vld [vmem:[#allocation2 + $0x138] sm:$0xff]   ;;  %v46_v4 = vld [vmem:[%s1393_s0 + $0x20] sm:$0xff] }
  0x28   :  { %988 = vmatprep.subr.bf16.mxu1 %v1106_v22  ;;  %v62_v0 = vpack.c.bf16 %v55_v63, %v48_v62  ;;  %v53_v5 = vld [vmem:[%s1393_s0 + $0x58] sm:$0xff]  ;;  %v1133_v7 = vld [vmem:[%s1396_s3] sm:$0xff]   ;;  %v1134_v8 = vld [vmem:[%s1396_s3 + $0x8] sm:$0xff]  }
  0x29   :  { %967 = vmatpush3.bf16.msra.mxu0 %v1105_v21  ;;  %v60_v6 = vpack.c.bf16 %v53_v5, %v46_v4  ;;  %v1135_v9 = vld [vmem:[%s1396_s3 + $0x10] sm:$0xff]   ;;  %v1136_v10 = vld [vmem:[%s1396_s3 + $0x18] sm:$0xff]   ;;  %v1137_v11 = vld [vmem:[%s1396_s3 + $0x20] sm:$0xff]  }
  0x2a   :  { %968 = vmatprep.subr.bf16.mxu0 %v1108_v24  ;;  %v1138_v12 = vld [vmem:[%s1396_s3 + $0x28] sm:$0xff]   ;;  %v1139_v13 = vld [vmem:[%s1396_s3 + $0x30] sm:$0xff]   ;;  %v1140_v14 = vld [vmem:[%s1396_s3 + $0x38] sm:$0xff]  }
  0x2b   :  { %989 = vmatpush3.bf16.msra.mxu1 %v1107_v23  ;;  %v1141_v15 = vld [vmem:[%s1398_s5] sm:$0xff]   ;;  %v1142_v16 = vld [vmem:[%s1398_s5 + $0x8] sm:$0xff]  }
  0x2c   :  { %990 = vmatprep.subr.bf16.mxu1 %v1110_v26  ;;  %v890_v18 = vld [vmem:[%s1395_s2] ss:$0 sm:$0xff] }
  0x2d   :  { %969 = vmatpush3.bf16.msra.mxu0 %v1109_v25 }
  0x2e   :  { %970 = vmatprep.subr.bf16.mxu0 %v1112_v28 }
  0x2f   :  { %991 = vmatpush3.bf16.msra.mxu1 %v1111_v27 }
  0x30   :  { %992 = vmatprep.subr.bf16.mxu1 %v1114_v30 }
  0x31   :  { %971 = vmatpush3.bf16.msra.mxu0 %v1113_v29 }
  0x32   :  { %1000 = vmatprep.subr.bf16.mxu0 %v1116_v38 }
  0x33   :  { %993 = vmatpush3.bf16.msra.mxu1 %v1115_v34 }
  0x34   :  { %1038 = vmatprep.subr.bf16.mxu1 %v1212_v43  ;;  %499 = vmatmul.mubr.bf16.vlgmr.msra.gmra.mrb[0].mxu0 %v56_v37 }
  0x35   :  { %1001 = vmatpush3.bf16.msra.mxu0 %v1117_v42  ;;  %580 = vmatprep.mubr.bf16.mxu0 %v61_v61 }
  0x36   :  { %540 = vmatmul.mubr.bf16.vlgmr.msra.gmra.mrb[0].mxu1 %v58_v46  ;;  %1002 = vmatprep.subr.bf16.mxu0 %v1118_v47 }
  0x37   :  { %1040 = vmatprep.mubr.msk.bf16.mxu1 %vm1213_vm0, %v1212_v43  ;;  %1039 = vmatpush3.bf16.msra.mxu1 %v1132_v56 }
  0x38   :  { %1044 = vmatprep.subr.bf16.mxu1 %v1212_v43 }
  0x39   :  { %1003 = vmatpush3.bf16.msra.mxu0 %v1119_v48 }
  0x3a   :  { %1004 = vmatprep.subr.bf16.mxu0 %v1120_v49 }
  0x3d   :  { %1005 = vmatpush3.bf16.msra.mxu0 %v1121_v50 }
  0x3e   :  { %1006 = vmatprep.subr.bf16.mxu0 %v1122_v51  ;;  %1041 = vmatmul.mubr.msk.bf16.vlgmr.msra.gmra.mrb[4].mxu1 %vm462_vm1, %v62_v0 }
  0x3f   :  { %1060 = vmatprep.mubr.msk.bf16.mxu1 %vm1213_vm0, %v1212_v43  ;;  %1045 = vmatpush3.bf16.msra.mxu1 %v1133_v7 }
  0x40   :  { %1046 = vmatprep.subr.bf16.mxu1 %v1212_v43 }
  0x41   :  { %1007 = vmatpush3.bf16.msra.mxu0 %v1123_v52  ;;  %v1143_v52 = vld [vmem:[%s1398_s5 + $0x10] sm:$0xff]  }
  0x42   :  { %1008 = vmatprep.subr.bf16.mxu0 %v1124_v53  ;;  %v1144_v53 = vld [vmem:[%s1398_s5 + $0x18] sm:$0xff]  }
  0x43   :  { %1047 = vmatpush3.bf16.msra.mxu1 %v1134_v8 }
  0x44   :  { %1048 = vmatprep.subr.bf16.mxu1 %v1212_v43 }
  0x45   :  { %1009 = vmatpush3.bf16.msra.mxu0 %v1125_v54  ;;  %v941_v54 = vld [vmem:[%s1397_s4] ss:$0 sm:$0xff]  ;;  %s1214_s4 = smov [#allocation5]  }
  0x46   :  { %1010 = vmatprep.subr.bf16.mxu0 %v1126_v55  ;;  %s878_s5 = sshll.u32 %s1214_s4, 4  ;;  %s879_s5 = int_to_ptr.vmem [resolvable:$true] %s878_s5 }
  0x47   :  { %1049 = vmatpush3.bf16.msra.mxu1 %v1135_v9  ;;  %p1188_p9 = scmp.lt.s32.totalorder %s879_s5, %s879_s5 }
  0x48   :  { %1050 = vmatprep.subr.bf16.mxu1 %v1212_v43 }
  0x49   :  { %1011 = vmatpush3.bf16.msra.mxu0 %v1127_v58 }
  0x4a   :  { %1012 = vmatprep.subr.bf16.mxu0 %v1128_v59 }
  0x4b   :  { %1051 = vmatpush3.bf16.msra.mxu1 %v1136_v10 }
  0x4c   :  { %1052 = vmatprep.subr.bf16.mxu1 %v1212_v43 }
  0x4d   :  { %1013 = vmatpush3.bf16.msra.mxu0 %v1129_v1 }
  0x4e   :  { %1014 = vmatprep.subr.bf16.mxu0 %v1130_v2 }
  0x4f   :  { %1053 = vmatpush3.bf16.msra.mxu1 %v1137_v11 }
  0x50   :  { %1054 = vmatprep.subr.bf16.mxu1 %v1212_v43 }
  0x51   :  { %1015 = vmatpush3.bf16.msra.mxu0 %v1131_v3 }
  0x52   :  { %1064 = vmatprep.subr.bf16.mxu0 %v1212_v43 }
  0x53   :  { %1055 = vmatpush3.bf16.msra.mxu1 %v1138_v12 }
  0x54   :  { %581 = vmatmul.mubr.bf16.vlgmr.msra.gmra.mrb[4].mxu0 %v60_v6  ;;  %1056 = vmatprep.subr.bf16.mxu1 %v1212_v43 }
  0x55   :  { %1072 = vmatprep.mubr.msk.bf16.mxu0 %vm1213_vm0, %v1212_v43  ;;  %1065 = vmatpush3.bf16.msra.mxu0 %v1141_v15 }
  0x56   :  { %1066 = vmatprep.subr.bf16.mxu0 %v1212_v43 }
  0x57   :  { %1057 = vmatpush3.bf16.msra.mxu1 %v1139_v13 }
  0x58   :  { %1058 = vmatprep.subr.bf16.mxu1 %v1212_v43 }
  0x59   :  { %1067 = vmatpush3.bf16.msra.mxu0 %v1142_v16 }
  0x5a   :  { %1068 = vmatprep.subr.bf16.mxu0 %v1212_v43 }
  0x5b   :  { %1059 = vmatpush3.bf16.msra.mxu1 %v1140_v14 }
  0x5d   :  { %1069 = vmatpush3.bf16.msra.mxu0 %v1143_v52 }
  0x5e   :  { %1070 = vmatprep.subr.bf16.mxu0 %v1212_v43  ;;  %v950_v43 = vld [vmem:[%s1399_s6] ss:$0 sm:$0xff]  ;;  %s1183_s6 = scalar_lea.vmem %s879_s5, 256 }
  0x5f   :  { %p1184_p8 = scmp.ne.s32.totalorder %s879_s5, %s1183_s6  ;;  %p1189_p10 = scmp.lt.s32.totalorder %s1183_s6, %s1183_s6 }
  0x61   :  { %1071 = vmatpush3.bf16.msra.mxu0 %v1144_v53  ;;  %p1190_p11 = por %p1189_p10, %p1188_p9 }
  0x63   :  { %p1191_p12 = pnand %p1190_p11, %p1184_p8 }
 0x107   :  { %v972_v17 = vpop.f32.mrb[0].mxu0 }
 0x108   :  { %v973_v19 = vpop.f32.mrb[1].mxu0 }
 0x109   :  { %v974_v20 = vadd.f32 %v973_v19, %v972_v17  ;;  %v975_v21 = vpop.f32.mrb[2].mxu0  ;;  %v994_v22 = vpop.f32.mrb[0].mxu1 }
 0x10a   :  { %v976_v23 = vpop.f32.mrb[3].mxu0  ;;  %v995_v26 = vpop.f32.mrb[1].mxu1 }
 0x10b   :  { %v501_v24 = vadd.f32 %v974_v20, %v890_v18  ;;  %v977_v25 = vadd.f32 %v976_v23, %v975_v21  ;;  %v996_v27 = vadd.f32 %v995_v26, %v994_v22  ;;  %v997_v28 = vpop.f32.mrb[2].mxu1 }
 0x10c   :  { %v998_v30 = vpop.f32.mrb[3].mxu1 }
 0x10d   :  { %v504_v29 = vadd.f32 %v977_v25, %v890_v18  ;;  %v542_v31 = vadd.f32 %v996_v27, %v501_v24  ;;  %v999_v32 = vadd.f32 %v998_v30, %v997_v28 }
 0x10f   :  { %v545_v33 = vadd.f32 %v999_v32, %v504_v29 }
 0x111   :  { %v623_v34 = vpop.f32.mrb[4].mxu1 }
 0x112   :  { %v1042_v35 = vpop.f32.mrb[5].mxu1 }
 0x113   :  { %v626_v36 = vpop.f32.mrb[6].mxu1 }
 0x114   :  { %v1043_v37 = vpop.f32.mrb[7].mxu1 }
 0x127   :  { %v1016_v38 = vpop.f32.mrb[4].mxu0 }
 0x128   :  { %v1017_v39 = vpop.f32.mrb[5].mxu0 }
 0x129   :  { %v1018_v40 = vadd.f32 %v1017_v39, %v1016_v38  ;;  %v1019_v41 = vpop.f32.mrb[6].mxu0 }
 0x12a   :  { %v1020_v42 = vpop.f32.mrb[7].mxu0 }
 0x12b   :  { %v583_v44 = vadd.f32 %v1018_v40, %v542_v31  ;;  %v1021_v45 = vadd.f32 %v1020_v42, %v1019_v41 }
 0x12d   :  { %v624_v46 = vadd.f32 %v623_v34, %v583_v44  ;;  %v586_v47 = vadd.f32 %v1021_v45, %v545_v33 }
 0x12f   :  { %v627_v48 = vadd.f32 %v626_v36, %v586_v47  ;;  %v630_v49 = vmax.f32 %v624_v46, 0.0 }
 0x131   :  { %v631_v50 = vmax.f32 %v627_v48, 0.0 }
 0x133   :  { %v632_v51 = vpack.c.bf16 %v631_v50, %v630_v49 }
 0x135   :  { %1061 = vmatmul.mubr.bf16.vlgmr.msra.gmra.mrb[8].mxu1 %v632_v51 }
 0x208   :  { %v738_v55 = vpop.f32.mrb[8].mxu1 }
 0x209   :  { %v739_v56 = vadd.f32 %v941_v54, %v738_v55  ;;  %v1062_v57 = vpop.f32.mrb[9].mxu1 }
 0x20a   :  { %v741_v58 = vpop.f32.mrb[10].mxu1 }
 0x20b   :  { %v742_v59 = vadd.f32 %v941_v54, %v741_v58  ;;  %v1063_v60 = vpop.f32.mrb[11].mxu1  ;;  %v745_v61 = vmax.f32 %v739_v56, 0.0 }
 0x20d   :  { %v746_v62 = vmax.f32 %v742_v59, 0.0 }
 0x20f   :  { %v747_v63 = vpack.c.bf16 %v746_v62, %v745_v61 }
 0x211   :  { %1073 = vmatmul.mubr.msk.bf16.vlgmr.msra.gmra.mrb[8].mxu0 %vm787_vm2, %v747_v63 }
 0x2e4   :  { %v825_v0 = vpop.f32.mrb[8].mxu0 }
 0x2e5   :  { %v826_v1 = vadd.f32 %v950_v43, %v825_v0  ;;  %v1074_v2 = vpop.f32.mrb[9].mxu0 }
 0x2e6   :  { %v828_v3 = vpop.f32.mrb[10].mxu0 }
 0x2e7   :  { %v832_v4 = vsub.f32 0.0, %v826_v1  ;;  %v829_v5 = vadd.f32 %v950_v43, %v828_v3  ;;  %v1075_v6 = vpop.f32.mrb[11].mxu0 }
 0x2e9   :  { %v834_v7 = vmul.f32 1.442695, %v832_v4  ;;  %v833_v8 = vsub.f32 0.0, %v829_v5 }
 0x2eb   :  { %1145 = vpow2.f32 %v834_v7  ;;  %v836_v9 = vmul.f32 1.442695, %v833_v8 }
 0x2ed   :  { %1147 = vpow2.f32 %v836_v9 }
 0x2f5   :  { %v1146_v10 = vpop.eup %1145 }
 0x2f6   :  { %v838_v11 = vadd.f32 1.0, %v1146_v10 }
 0x2f7   :  { %v1148_v12 = vpop.eup %1147 }
 0x2f8   :  { %1149 = vrcp.f32 %v838_v11  ;;  %v839_v13 = vadd.f32 1.0, %v1148_v12 }
 0x2fa   :  { %1151 = vrcp.f32 %v839_v13 }
 0x302   :  { %v1150_v14 = vpop.eup %1149 }
 0x303   :  { %v845_v15 = vsel %vm844_vm3, %v1150_v14, -inf }
 0x304   :  { %v1152_v16 = vpop.eup %1151  ;;  %846 = vmax.xlane.f32.xlu0 %v845_v15 }
 0x305   :  { %v848_v17 = vsel %vm844_vm3, %v1152_v16, -inf }
 0x308   :  { %849 = vmax.xlane.f32.xlu0 %v848_v17 }
 0x391   :  { %v847_v18 = vpop.xlane.xlu0 %846 }
 0x392   :  { %v851_v19 = vsub.f32 %v1150_v14, %v847_v18 }
 0x394   :  { %v853_v20 = vmul.f32 1.442695, %v851_v19 }
 0x395   :  { %v850_v21 = vpop.xlane.xlu0 %849 }
 0x396   :  { %1153 = vpow2.f32 %v853_v20  ;;  %v852_v22 = vsub.f32 %v1152_v16, %v850_v21 }
 0x398   :  { %v855_v23 = vmul.f32 1.442695, %v852_v22 }
 0x39a   :  { %1155 = vpow2.f32 %v855_v23 }
 0x3a0   :  { %v1154_v24 = vpop.eup %1153 }
 0x3a1   :  { %v857_v25 = vsel %vm844_vm3, %v1154_v24, 0.0 }
 0x3a2   :  { %858 = vadd.xlane.f32.xlu1 %v857_v25 }
 0x3a4   :  { %v1156_v26 = vpop.eup %1155 }
 0x3a5   :  { %v860_v27 = vsel %vm844_vm3, %v1156_v26, 0.0 }
 0x3a6   :  { %861 = vadd.xlane.f32.xlu1 %v860_v27 }
 0x42f   :  { %v859_v28 = vpop.xlane.xlu1 %858 }
 0x430   :  { %1157 = vlog2.f32 %v859_v28 }
 0x433   :  { %v862_v29 = vpop.xlane.xlu1 %861 }
 0x434   :  { %1159 = vlog2.f32 %v862_v29 }
 0x43a   :  { %v1158_v30 = vpop.eup %1157 }
 0x43b   :  { %v864_v31 = vmul.f32 0.6931472, %v1158_v30 }
 0x43d   :  { %v867_v32 = vadd.f32 %v864_v31, %v847_v18 }
 0x43e   :  { %v1160_v33 = vpop.eup %1159 }
 0x43f   :  { %v869_v34 = vsub.f32 %v1150_v14, %v867_v32  ;;  %v866_v35 = vmul.f32 0.6931472, %v1160_v33 }
 0x441   :  { %871 = vst.msk [vmem:[#allocation5] sm:$0xff] %vm844_vm3, %v869_v34  ;;  %v868_v36 = vadd.f32 %v866_v35, %v850_v21 }
 0x443   :  { %v870_v37 = vsub.f32 %v1152_v16, %v868_v36 }
 0x445   :  { %872 = vst.msk [vmem:[#allocation5 + $0x8] sm:$0xff] %vm844_vm3, %v870_v37 }
 0x446   :  { %1194 = shalt.err (!%p1191_p12)
}
 0x447   :  { %s1195_s22 = scalar_lea.hbm %s1400_s7, 256 }
 0x448   :  { %p1196_p13 = scmp.ne.s32.totalorder %s1400_s7, %s1195_s22  ;;  %p1199_p0 = scmp.lt.u32.totalorder %s1195_s22, %s1400_s7 }
 0x44a   :  { %p1201_p1 = pnand %p1199_p0, %p1196_p13 }
 0x44c   :  { %1204 = shalt.err (!%p1201_p1)
}
 0x44d   :  { %s1215_s27 = smov 128   ;;  %s1216_s28 = smov 8  }
 0x44e   :  { %884 = dma.vmem_to_hbm [thread:$0]  %s879_s5, 256, %s1400_s7, [#allocation4], %s1215_s27, %s1215_s27, %s1216_s28  }
 0x44f   :  { %1207 = dma.done.wait [#allocation4], 256  }
 0x450   :  { %1208 = vsyncadd [#allocation4], 4294967040 }
 0x451   :  { %888 = vsyncpa [#allocation3], 1 }
 0x452   :  { %889 = vsyncpa [#allocation4], 1 }

</bundles_post_ra>
